<compile_context>
chip_gen: v7x
topology: tpu7x:2x2x1
jax: 0.10.0
libtpu: 0.0.40
codegen_flags: <defaults>
</compile_context>

<pallas_src>
import functools

import jax
import jax.numpy as jnp
from jax.experimental import pallas as pl
from jax.experimental.pallas import tpu as pltpu

_LANE = 128
_VMEM_LIMIT_BYTES = 48 * 1024 * 1024  # fits v7x's 64 MiB physical VMEM


def _round_up(n, m):
    return ((n + m - 1) // m) * m


def _pad2(x, rows, cols):
    return jnp.pad(x, ((0, rows - x.shape[0]), (0, cols - x.shape[1])))


def _pick_tile(n_pad, target):
    """Largest power-of-two multiple of 128 that divides n_pad and is <= target."""
    for cand in (4096, 2048, 1024, 512, 256, 128):
        if cand <= target and n_pad % cand == 0:
            return cand
    return _LANE


# ---------------------------------------------------------------------------
# SAGE layer:  h = relu( (A @ x) * inv_deg @ Wl  +  x @ Wr  +  b )
# grid = (N_pad // TM, N_pad // TK); K (A column tile) is the reduction axis.
# A is int8 edge counts (upcast to bf16 in-kernel); normalization is an f32
# per-row scale applied at finalize.
# ---------------------------------------------------------------------------
def _sage_layer_kernel(a_ref, xk_ref, xi_ref, wl_ref, wr_ref, b_ref,
                       inv_deg_ref, out_ref, acc_ref, root_ref):
    k = pl.program_id(1)

    @pl.when(k == 0)
    def _():
        acc_ref[...] = jnp.zeros_like(acc_ref)
        # Root path computed once per row tile, overlapped with A streaming.
        root_ref[...] = jnp.dot(xi_ref[...], wr_ref[...],
                                preferred_element_type=jnp.float32)

    # Neighbour aggregation (edge-count weighted sum), f32 accumulation on MXU.
    acc_ref[...] += jnp.dot(a_ref[...].astype(jnp.bfloat16), xk_ref[...],
                            preferred_element_type=jnp.float32)

    @pl.when(k == pl.num_programs(1) - 1)
    def _():
        agg = (acc_ref[...] * inv_deg_ref[...]).astype(jnp.bfloat16)  # mean
        h = (jnp.dot(agg, wl_ref[...], preferred_element_type=jnp.float32)
             + root_ref[...] + b_ref[...])
        out_ref[...] = jnp.maximum(h, 0.0).astype(out_ref.dtype)


def _sage_layer(a, x, inv_deg, wl, wr, b, *, tm, tk):
    n_pad = a.shape[0]
    fp = x.shape[1]
    hp = wl.shape[1]
    n_row_tiles = n_pad // tm
    cost = pl.CostEstimate(
        flops=int(2 * n_pad * n_pad * fp + 2 * 2 * n_pad * fp * hp),
        transcendentals=0,
        bytes_accessed=int(
            n_pad * n_pad * 1                       # A (int8), read once
            + n_row_tiles * n_pad * fp * 2          # x_k re-read per row tile
            + n_pad * fp * 2                        # x_i
            + n_row_tiles * 2 * fp * hp * 2         # Wl/Wr per row tile
            + n_pad * hp * 2),                      # output
    )
    return pl.pallas_call(
        _sage_layer_kernel,
        out_shape=jax.ShapeDtypeStruct((n_pad, hp), jnp.bfloat16),
        grid_spec=pltpu.PrefetchScalarGridSpec(
            num_scalar_prefetch=0,
            grid=(n_pad // tm, n_pad // tk),
            in_specs=[
                pl.BlockSpec((tm, tk), lambda i, k: (i, k)),     # A tile (int8)
                pl.BlockSpec((tk, fp), lambda i, k: (k, 0)),     # x (neighbours)
                pl.BlockSpec((tm, fp), lambda i, k: (i, 0)),     # x (root rows)
                pl.BlockSpec((fp, hp), lambda i, k: (0, 0)),     # Wl
                pl.BlockSpec((fp, hp), lambda i, k: (0, 0)),     # Wr
                pl.BlockSpec((1, hp), lambda i, k: (0, 0)),      # bias
                pl.BlockSpec((tm, 1), lambda i, k: (i, 0)),      # 1/deg (f32)
            ],
            out_specs=pl.BlockSpec((tm, hp), lambda i, k: (i, 0)),
            scratch_shapes=[pltpu.VMEM((tm, fp), jnp.float32),   # agg acc
                            pltpu.VMEM((tm, hp), jnp.float32)],  # root path
        ),
        compiler_params=pltpu.CompilerParams(
            dimension_semantics=("parallel", "arbitrary"),
            vmem_limit_bytes=_VMEM_LIMIT_BYTES),
        cost_estimate=cost,
    )(a, x, x, wl, wr, b, inv_deg)


# ---------------------------------------------------------------------------
# Head: global_mean_pool (tiled reduction over nodes, binary P + f32 1/count)
# + lin1/relu + dropout(eval: identity) + lin2 + masked log_softmax.
# ---------------------------------------------------------------------------
def _head_kernel(num_classes, p_ref, h_ref, inv_cnt_ref, w1_ref, b1_ref,
                 w2_ref, b2_ref, out_ref, acc_ref):
    k = pl.program_id(0)

    @pl.when(k == 0)
    def _():
        acc_ref[...] = jnp.zeros_like(acc_ref)

    acc_ref[...] += jnp.dot(p_ref[...], h_ref[...].astype(jnp.float32),
                            preferred_element_type=jnp.float32)

    @pl.when(k == pl.num_programs(0) - 1)
    def _():
        g = (acc_ref[...] * inv_cnt_ref[...]).astype(jnp.bfloat16)   # mean pool
        g = jnp.maximum(
            jnp.dot(g, w1_ref[...], preferred_element_type=jnp.float32)
            + b1_ref[...], 0.0)
        # F.dropout(p=0.5) is identity in eval mode.
        logits = jnp.dot(g.astype(jnp.bfloat16), w2_ref[...],
                         preferred_element_type=jnp.float32) + b2_ref[...]
        # mask lane-padding columns so they do not perturb the log_softmax
        col = jax.lax.broadcasted_iota(jnp.int32, logits.shape, 1)
        logits = jnp.where(col < num_classes, logits, -jnp.inf)
        m = jnp.max(logits, axis=-1, keepdims=True)
        lse = jnp.log(jnp.sum(jnp.exp(logits - m), axis=-1, keepdims=True)) + m
        out_ref[...] = logits - lse


def _head(p, h, inv_cnt, w1, b1, w2, b2, num_classes, *, tk):
    g_pad, n_pad = p.shape
    hp = w1.shape[1]
    cp = w2.shape[1]
    kernel = functools.partial(_head_kernel, num_classes)
    return pl.pallas_call(
        kernel,
        out_shape=jax.ShapeDtypeStruct((g_pad, cp), jnp.float32),
        grid_spec=pltpu.PrefetchScalarGridSpec(
            num_scalar_prefetch=0,
            grid=(n_pad // tk,),
            in_specs=[
                pl.BlockSpec((g_pad, tk), lambda k: (0, k)),   # pool tile (f32, 0/1)
                pl.BlockSpec((tk, hp), lambda k: (k, 0)),      # node features tile
                pl.BlockSpec((g_pad, 1), lambda k: (0, 0)),    # 1/count (f32)
                pl.BlockSpec((hp, hp), lambda k: (0, 0)),      # lin1 weight
                pl.BlockSpec((1, hp), lambda k: (0, 0)),       # lin1 bias
                pl.BlockSpec((hp, cp), lambda k: (0, 0)),      # lin2 weight
                pl.BlockSpec((1, cp), lambda k: (0, 0)),       # lin2 bias
            ],
            out_specs=pl.BlockSpec((g_pad, cp), lambda k: (0, 0)),
            scratch_shapes=[pltpu.VMEM((g_pad, hp), jnp.float32)],
        ),
        compiler_params=pltpu.CompilerParams(
            dimension_semantics=("arbitrary",),
            vmem_limit_bytes=_VMEM_LIMIT_BYTES),
    )(p, h, inv_cnt, w1, b1, w2, b2)


# ---------------------------------------------------------------------------
# Forward wrapper
# ---------------------------------------------------------------------------
def graphsage_forward(x, edge_index, batch, params, num_graphs):
    """conv1 -> relu -> conv2 -> relu -> global_mean_pool -> lin1 -> relu ->
    dropout(eval: identity) -> lin2 -> log_softmax."""
    N, f_in = x.shape
    (wl1, bl1, wr1), (wl2, bl2, wr2), (w1, b1), (w2, b2) = params
    hidden = wl1.shape[0]
    num_classes = w2.shape[0]

    # ---- padded / tiled geometry (adaptive: tiles divide n_pad exactly) ----
    fp = _round_up(f_in, _LANE)
    hp = _round_up(hidden, _LANE)
    cp = _round_up(num_classes, _LANE)
    n_pad = _round_up(N, _LANE)
    tm = _pick_tile(n_pad, 512)
    tk = _pick_tile(n_pad, 2048)
    # keep >= 2 row tiles so the "parallel" axis can span both v7x TensorCores
    if n_pad // tm < 2 and tm > _LANE:
        tm //= 2
    g_pad = _round_up(num_graphs, 8)

    # ---- adjacency: int8 edge counts scattered directly into the padded slab,
    #      degrees via an O(E) segment-sum (no dense f32 N^2 intermediates) ----
    src, dst = edge_index[0], edge_index[1]
    a = jnp.zeros((n_pad, n_pad), jnp.int8).at[dst, src].add(
        jnp.ones_like(src, jnp.int8))
    deg = jnp.zeros((n_pad,), jnp.float32).at[dst].add(1.0)
    inv_deg = jnp.where(deg > 0, 1.0 / jnp.maximum(deg, 1.0), 0.0)[:, None]

    # ---- global mean-pool: binary membership matrix + f32 1/count ----
    onehot = (batch[None, :] == jnp.arange(num_graphs)[:, None]).astype(jnp.float32)
    p = _pad2(onehot, g_pad, n_pad)
    cnt = jnp.zeros((num_graphs,), jnp.float32).at[batch].add(1.0)
    inv_cnt = jnp.pad(
        jnp.where(cnt > 0, 1.0 / jnp.maximum(cnt, 1.0), 0.0),
        (0, g_pad - num_graphs))[:, None]

    x_pad = _pad2(x.astype(jnp.float32), n_pad, fp).astype(jnp.bfloat16)

    # ---- weights: transpose to (in, out), zero-pad to lanes ----
    wl1p = _pad2(wl1.T, fp, hp).astype(jnp.bfloat16)
    wr1p = _pad2(wr1.T, fp, hp).astype(jnp.bfloat16)
    bl1p = _pad2(bl1[None, :], 1, hp).astype(jnp.float32)
    wl2p = _pad2(wl2.T, hp, hp).astype(jnp.bfloat16)
    wr2p = _pad2(wr2.T, hp, hp).astype(jnp.bfloat16)
    bl2p = _pad2(bl2[None, :], 1, hp).astype(jnp.float32)
    w1p = _pad2(w1.T, hp, hp).astype(jnp.bfloat16)
    b1p = _pad2(b1[None, :], 1, hp).astype(jnp.float32)
    w2p = _pad2(w2.T, hp, cp).astype(jnp.bfloat16)
    b2p = _pad2(b2[None, :], 1, cp).astype(jnp.float32)

    # ---- 2 SAGE layers + pooled MLP head ----
    h = _sage_layer(a, x_pad, inv_deg, wl1p, wr1p, bl1p, tm=tm, tk=tk)
    h = _sage_layer(a, h, inv_deg, wl2p, wr2p, bl2p, tm=tm, tk=tk)
    out = _head(p, h, inv_cnt, w1p, b1p, w2p, b2p, num_classes, tk=tk)
    return out[:num_graphs, :num_classes]


def init_params(key, input_dim, hidden, num_classes):
    ks = jax.random.split(key, 8)
    scale = 0.1
    # SAGEConv1: lin_l (neighbour path, with bias), lin_r (root path, no bias)
    wl1 = scale * jax.random.normal(ks[0], (hidden, input_dim), jnp.float32)
    bl1 = scale * jax.random.normal(ks[1], (hidden,), jnp.float32)
    wr1 = scale * jax.random.normal(ks[2], (hidden, input_dim), jnp.float32)
    # SAGEConv2 (hidden -> hidden)
    wl2 = scale * jax.random.normal(ks[3], (hidden, hidden), jnp.float32)
    bl2 = scale * jax.random.normal(ks[4], (hidden,), jnp.float32)
    wr2 = scale * jax.random.normal(ks[5], (hidden, hidden), jnp.float32)
    # lin1 (hidden -> hidden), lin2 (hidden -> num_classes)
    w1 = scale * jax.random.normal(ks[6], (hidden, hidden), jnp.float32)
    b1 = jnp.zeros((hidden,), jnp.float32)
    w2 = scale * jax.random.normal(ks[7], (num_classes, hidden), jnp.float32)
    b2 = jnp.zeros((num_classes,), jnp.float32)
    return ((wl1, bl1, wr1), (wl2, bl2, wr2), (w1, b1), (w2, b2))


if __name__ == "__main__":
    key = jax.random.PRNGKey(0)
    k_x, k_e, k_p = jax.random.split(key, 3)

    # Small synthetic "dataset": 16 nodes, 8 input features, 2 graphs,
    # hidden=32, 4 output classes, num_layers=2 (conv1 + one extra conv).
    N, F_IN, HIDDEN, NUM_CLASSES, NUM_GRAPHS, E = 16, 8, 32, 4, 2, 40

    x = jax.random.normal(k_x, (N, F_IN), jnp.float32)
    edge_index = jax.random.randint(k_e, (2, E), 0, N, jnp.int32)
    batch = jnp.concatenate([jnp.zeros((N // 2,), jnp.int32),
                             jnp.ones((N - N // 2,), jnp.int32)])

    params = init_params(k_p, F_IN, HIDDEN, NUM_CLASSES)

    out = graphsage_forward(x, edge_index, batch, params, NUM_GRAPHS)
    out = jax.block_until_ready(out)
    assert out.shape == (NUM_GRAPHS, NUM_CLASSES)
    assert bool(jnp.all(jnp.isfinite(out)))
    print("KERNEL_OK")
</pallas_src>

<mosaic_0001>
module attributes {stable_mosaic.version = 11 : i64} {
  func.func @_sage_layer_kernel(%arg0: i32, %arg1: i32, %arg2: memref<128x128xi8, #tpu.memory_space<vmem>>, %arg3: memref<128x128xbf16, #tpu.memory_space<vmem>>, %arg4: memref<128x128xbf16, #tpu.memory_space<vmem>>, %arg5: memref<128x128xbf16, #tpu.memory_space<vmem>>, %arg6: memref<128x128xbf16, #tpu.memory_space<vmem>>, %arg7: memref<1x128xf32, #tpu.memory_space<vmem>>, %arg8: memref<128x1xf32, #tpu.memory_space<vmem>>, %arg9: memref<128x128xbf16, #tpu.memory_space<vmem>>, %arg10: memref<128x128xf32, #tpu.memory_space<vmem>>, %arg11: memref<128x128xf32, #tpu.memory_space<vmem>>) attributes {dimension_semantics = [#tpu.dimension_semantics<parallel>, #tpu.dimension_semantics<arbitrary>], iteration_bounds = array<i64: 1, 1>, scalar_prefetch = 0 : i64, scratch_operands = 2 : i64, tpu.core_type = #tpu.core_type<tc>, window_params = [{transform_indices = @transform_0, window_bounds = array<i64: 128, 128>}, {transform_indices = @transform_1, window_bounds = array<i64: 128, 128>}, {transform_indices = @transform_2, window_bounds = array<i64: 128, 128>}, {pipeline_mode = #tpu.pipeline_mode<synchronous>, transform_indices = @transform_3, window_bounds = array<i64: 128, 128>}, {pipeline_mode = #tpu.pipeline_mode<synchronous>, transform_indices = @transform_4, window_bounds = array<i64: 128, 128>}, {pipeline_mode = #tpu.pipeline_mode<synchronous>, transform_indices = @transform_5, window_bounds = array<i64: 1, 128>}, {transform_indices = @transform_6, window_bounds = array<i64: 128, 1>}, {transform_indices = @transform_7, window_bounds = array<i64: 128, 128>}]} {
    %c0_i32 = arith.constant 0 : i32
    %0 = arith.cmpi eq, %arg1, %c0_i32 : i32
    %1 = arith.extui %0 : i1 to i32
    %c0_i32_0 = arith.constant 0 : i32
    %2 = arith.cmpi ne, %1, %c0_i32_0 : i32
    scf.if %2 {
      %cst_10 = arith.constant 0.000000e+00 : f32
      %13 = vector.broadcast %cst_10 : f32 to vector<128x128xf32>
      %c0_11 = arith.constant 0 : index
      %c0_12 = arith.constant 0 : index
      %14 = vector.load %arg10[%c0_11, %c0_12] : memref<128x128xf32, #tpu.memory_space<vmem>>, vector<128x128xf32>
      tpu.vector_store %arg10[%c0_11, %c0_12], %13 {strides = array<i32>} : memref<128x128xf32, #tpu.memory_space<vmem>>, vector<128x128xf32>,
      %c0_13 = arith.constant 0 : index
      %c0_14 = arith.constant 0 : index
      %15 = vector.load %arg4[%c0_13, %c0_14] : memref<128x128xbf16, #tpu.memory_space<vmem>>, vector<128x128xbf16>
      %c0_15 = arith.constant 0 : index
      %c0_16 = arith.constant 0 : index
      %16 = vector.load %arg6[%c0_15, %c0_16] : memref<128x128xbf16, #tpu.memory_space<vmem>>, vector<128x128xbf16>
      %cst_17 = arith.constant dense<0.000000e+00> : vector<128x128xf32>
      %17 = tpu.matmul %15, %16, %cst_17 {dimension_numbers = #tpu.dot_dimension_numbers<[1], [0], [0], [1], [0, 0, 1, 1], [], []>} : vector<128x128xbf16>, vector<128x128xbf16>, vector<128x128xf32> -> vector<128x128xf32>
      %c0_18 = arith.constant 0 : index
      %c0_19 = arith.constant 0 : index
      %18 = vector.load %arg11[%c0_18, %c0_19] : memref<128x128xf32, #tpu.memory_space<vmem>>, vector<128x128xf32>
      tpu.vector_store %arg11[%c0_18, %c0_19], %17 {strides = array<i32>} : memref<128x128xf32, #tpu.memory_space<vmem>>, vector<128x128xf32>,
    } else {
    }
    %c0 = arith.constant 0 : index
    %c0_1 = arith.constant 0 : index
    %3 = vector.load %arg10[%c0, %c0_1] : memref<128x128xf32, #tpu.memory_space<vmem>>, vector<128x128xf32>
    %c0_2 = arith.constant 0 : index
    %c0_3 = arith.constant 0 : index
    %4 = vector.load %arg2[%c0_2, %c0_3] : memref<128x128xi8, #tpu.memory_space<vmem>>, vector<128x128xi8>
    %5 = arith.sitofp %4 : vector<128x128xi8> to vector<128x128xbf16>
    %c0_4 = arith.constant 0 : index
    %c0_5 = arith.constant 0 : index
    %6 = vector.load %arg3[%c0_4, %c0_5] : memref<128x128xbf16, #tpu.memory_space<vmem>>, vector<128x128xbf16>
    %cst = arith.constant dense<0.000000e+00> : vector<128x128xf32>
    %7 = tpu.matmul %5, %6, %cst {dimension_numbers = #tpu.dot_dimension_numbers<[1], [0], [0], [1], [0, 0, 1, 1], [], []>} : vector<128x128xbf16>, vector<128x128xbf16>, vector<128x128xf32> -> vector<128x128xf32>
    %8 = arith.addf %3, %7 : vector<128x128xf32>
    %c0_6 = arith.constant 0 : index
    %c0_7 = arith.constant 0 : index
    %9 = vector.load %arg10[%c0_6, %c0_7] : memref<128x128xf32, #tpu.memory_space<vmem>>, vector<128x128xf32>
    tpu.vector_store %arg10[%c0_6, %c0_7], %8 {strides = array<i32>} : memref<128x128xf32, #tpu.memory_space<vmem>>, vector<128x128xf32>,
    %c0_i32_8 = arith.constant 0 : i32
    %10 = arith.cmpi eq, %arg1, %c0_i32_8 : i32
    %11 = arith.extui %10 : i1 to i32
    %c0_i32_9 = arith.constant 0 : i32
    %12 = arith.cmpi ne, %11, %c0_i32_9 : i32
    scf.if %12 {
      %c0_10 = arith.constant 0 : index
      %c0_11 = arith.constant 0 : index
      %13 = vector.load %arg10[%c0_10, %c0_11] : memref<128x128xf32, #tpu.memory_space<vmem>>, vector<128x128xf32>
      %c0_12 = arith.constant 0 : index
      %c0_13 = arith.constant 0 : index
      %14 = vector.load %arg8[%c0_12, %c0_13] : memref<128x1xf32, #tpu.memory_space<vmem>>, vector<128x1xf32>
      %15 = vector.broadcast %14 : vector<128x1xf32> to vector<128x128xf32>
      %16 = arith.mulf %13, %15 : vector<128x128xf32>
      %17 = arith.truncf %16 : vector<128x128xf32> to vector<128x128xbf16>
      %c0_14 = arith.constant 0 : index
      %c0_15 = arith.constant 0 : index
      %18 = vector.load %arg5[%c0_14, %c0_15] : memref<128x128xbf16, #tpu.memory_space<vmem>>, vector<128x128xbf16>
      %cst_16 = arith.constant dense<0.000000e+00> : vector<128x128xf32>
      %19 = tpu.matmul %17, %18, %cst_16 {dimension_numbers = #tpu.dot_dimension_numbers<[1], [0], [0], [1], [0, 0, 1, 1], [], []>} : vector<128x128xbf16>, vector<128x128xbf16>, vector<128x128xf32> -> vector<128x128xf32>
      %c0_17 = arith.constant 0 : index
      %c0_18 = arith.constant 0 : index
      %20 = vector.load %arg11[%c0_17, %c0_18] : memref<128x128xf32, #tpu.memory_space<vmem>>, vector<128x128xf32>
      %21 = arith.addf %19, %20 : vector<128x128xf32>
      %c0_19 = arith.constant 0 : index
      %c0_20 = arith.constant 0 : index
      %22 = vector.load %arg7[%c0_19, %c0_20] : memref<1x128xf32, #tpu.memory_space<vmem>>, vector<1x128xf32>
      %23 = vector.broadcast %22 : vector<1x128xf32> to vector<128x128xf32>
      %24 = arith.addf %21, %23 : vector<128x128xf32>
      %cst_21 = arith.constant 0.000000e+00 : f32
      %25 = vector.broadcast %cst_21 : f32 to vector<128x128xf32>
      %26 = arith.maximumf %24, %25 : vector<128x128xf32>
      %27 = arith.truncf %26 : vector<128x128xf32> to vector<128x128xbf16>
      %c0_22 = arith.constant 0 : index
      %c0_23 = arith.constant 0 : index
      %28 = vector.load %arg9[%c0_22, %c0_23] : memref<128x128xbf16, #tpu.memory_space<vmem>>, vector<128x128xbf16>
      tpu.vector_store %arg9[%c0_22, %c0_23], %27 {strides = array<i32>} : memref<128x128xbf16, #tpu.memory_space<vmem>>, vector<128x128xbf16>,
    } else {
    }
    return
  }
  func.func @transform_0(%arg0: i32, %arg1: i32) -> (i32, i32) {
    %c0_i32 = arith.constant 0 : i32
    return %arg0, %arg1 : i32, i32
  }
  func.func @transform_1(%arg0: i32, %arg1: i32) -> (i32, i32) {
    %c0_i32 = arith.constant 0 : i32
    %c0_i32_0 = arith.constant 0 : i32
    return %arg1, %c0_i32 : i32, i32
  }
  func.func @transform_2(%arg0: i32, %arg1: i32) -> (i32, i32) {
    %c0_i32 = arith.constant 0 : i32
    %c0_i32_0 = arith.constant 0 : i32
    return %arg0, %c0_i32 : i32, i32
  }
  func.func @transform_3(%arg0: i32, %arg1: i32) -> (i32, i32) {
    %c0_i32 = arith.constant 0 : i32
    %c0_i32_0 = arith.constant 0 : i32
    %c0_i32_1 = arith.constant 0 : i32
    return %c0_i32, %c0_i32_0 : i32, i32
  }
  func.func @transform_4(%arg0: i32, %arg1: i32) -> (i32, i32) {
    %c0_i32 = arith.constant 0 : i32
    %c0_i32_0 = arith.constant 0 : i32
    %c0_i32_1 = arith.constant 0 : i32
    return %c0_i32, %c0_i32_0 : i32, i32
  }
  func.func @transform_5(%arg0: i32, %arg1: i32) -> (i32, i32) {
    %c0_i32 = arith.constant 0 : i32
    %c0_i32_0 = arith.constant 0 : i32
    %c0_i32_1 = arith.constant 0 : i32
    return %c0_i32, %c0_i32_0 : i32, i32
  }
  func.func @transform_6(%arg0: i32, %arg1: i32) -> (i32, i32) {
    %c0_i32 = arith.constant 0 : i32
    %c0_i32_0 = arith.constant 0 : i32
    return %arg0, %c0_i32 : i32, i32
  }
  func.func @transform_7(%arg0: i32, %arg1: i32) -> (i32, i32) {
    %c0_i32 = arith.constant 0 : i32
    %c0_i32_0 = arith.constant 0 : i32
    return %arg0, %c0_i32 : i32, i32
  }
}

</mosaic_0001>

<bundles_post_ra>
// kernel: tpu_custom_call.1
= control target key start
LH: loop header
LB: loop body
LE: loop exit
PB: predicated region body
PF: predicated region fallthrough
CT: control target
= control target key end

     0   :  { %12 = vsyncpa [#allocation5], 0  ;;  %s1659_s0 = inlined_call_operand.hbm [shape: s8[128,128], index: 0, kind: input, shape index: {}]   ;;  %s1660_s1 = inlined_call_operand.vmem [shape: bf16[128,128], index: 1, kind: input, shape index: {}]   ;;  %s1661_s2 = inlined_call_operand.vmem [shape: bf16[128,128], index: 2, kind: input, shape index: {}]   ;;  %s1662_s3 = inlined_call_operand.hbm [shape: bf16[128,128], index: 3, kind: input, shape index: {}]   ;;  %s1663_s4 = inlined_call_operand.hbm [shape: bf16[128,128], index: 4, kind: input, shape index: {}]   ;;  %s1664_s5 = inlined_call_operand.vmem [shape: f32[1,128], index: 5, kind: input, shape index: {}]   ;;  %s1665_s6 = inlined_call_operand.vmem [shape: f32[128,1], index: 6, kind: input, shape index: {}]   ;;  %s1666_s7 = inlined_call_operand.hbm [shape: bf16[128,128], index: 7, kind: output, shape index: {}]  }
   0x1   :  { %13 = vsyncpa [#allocation8], 0 }
   0x2   :  { %14 = vsyncpa [#allocation6], 0  ;;  %s1429_s24 = smov [#allocation7]   ;;  %s1335_s28 = scalar_lea.hbm %s1662_s3, 1024 }
   0x3   :  { %s36_s25 = sshll.u32 %s1429_s24, 4  ;;  %p1336_p0 = scmp.ne.s32.totalorder %s1662_s3, %s1335_s28  ;;  %s37_s25 = int_to_ptr.vmem [resolvable:$true] %s36_s25 }
   0x4   :  { %p1339_p1 = scmp.lt.u32.totalorder %s1335_s28, %s1662_s3 }
   0x6   :  { %p1341_p2 = pnand %p1339_p1, %p1336_p0 }
   0x8   :  { %1344 = shalt.err (!%p1341_p2)
}
   0x9   :  { %s1345_s10 = scalar_lea.vmem %s37_s25, 1024  ;;  %p1350_p4 = scmp.lt.s32.totalorder %s37_s25, %s37_s25 }
   0xa   :  { %p1346_p3 = scmp.ne.s32.totalorder %s37_s25, %s1345_s10  ;;  %p1351_p5 = scmp.lt.s32.totalorder %s1345_s10, %s1345_s10 }
   0xc   :  { %p1352_p6 = por %p1351_p5, %p1350_p4 }
   0xe   :  { %p1353_p7 = pnand %p1352_p6, %p1346_p3 }
  0x10   :  { %1356 = shalt.err (!%p1353_p7)
}
  0x11   :  { %s1430_s11 = smov 64   ;;  %s1431_s12 = smov 4  }
  0x12   :  { %42 = dma.hbm_to_vmem [thread:$0]  %s1662_s3, 1024, %s37_s25, [#allocation8], %s1430_s11, %s1430_s11, %s1431_s12  }
  0x13   :  { %s1432_s15 = smov [#allocation4]   ;;  %s1357_s19 = scalar_lea.hbm %s1659_s0, 512 }
  0x14   :  { %s20_s16 = sshll.u32 %s1432_s15, 4  ;;  %p1358_p8 = scmp.ne.s32.totalorder %s1659_s0, %s1357_s19  ;;  %s21_s16 = int_to_ptr.vmem [resolvable:$true] %s20_s16 }
  0x15   :  { %p1361_p9 = scmp.lt.u32.totalorder %s1357_s19, %s1659_s0 }
  0x17   :  { %p1363_p10 = pnand %p1361_p9, %p1358_p8 }
  0x19   :  { %1366 = shalt.err (!%p1363_p10)
}
  0x1a   :  { %s1367_s24 = scalar_lea.vmem %s21_s16, 512  ;;  %p1372_p12 = scmp.lt.s32.totalorder %s21_s16, %s21_s16 }
  0x1b   :  { %p1368_p11 = scmp.ne.s32.totalorder %s21_s16, %s1367_s24  ;;  %p1373_p13 = scmp.lt.s32.totalorder %s1367_s24, %s1367_s24 }
  0x1d   :  { %p1374_p0 = por %p1373_p13, %p1372_p12 }
  0x1f   :  { %p1375_p1 = pnand %p1374_p0, %p1368_p11 }
  0x21   :  { %1378 = shalt.err (!%p1375_p1)
}
  0x22   :  { %s1433_s3 = smov 128   ;;  %s1434_s25 = smov 8  }
  0x23   :  { %26 = dma.hbm_to_vmem [thread:$0]  %s1659_s0, 512, %s21_s16, [#allocation5], %s1433_s3, %s1433_s3, %s1434_s25  }
  0x24   :  { %s1435_s28 = smov [#allocation9]   ;;  %s1379_s9 = scalar_lea.hbm %s1663_s4, 1024 }
  0x25   :  { %s48_s29 = sshll.u32 %s1435_s28, 4  ;;  %p1380_p2 = scmp.ne.s32.totalorder %s1663_s4, %s1379_s9  ;;  %s49_s29 = int_to_ptr.vmem [resolvable:$true] %s48_s29 }
  0x26   :  { %p1383_p3 = scmp.lt.u32.totalorder %s1379_s9, %s1663_s4 }
  0x28   :  { %p1385_p4 = pnand %p1383_p3, %p1380_p2 }
  0x2a   :  { %1388 = shalt.err (!%p1385_p4)
}
  0x2b   :  { %s1389_s17 = scalar_lea.vmem %s49_s29, 1024  ;;  %p1394_p6 = scmp.lt.s32.totalorder %s49_s29, %s49_s29 }
  0x2c   :  { %p1390_p5 = scmp.ne.s32.totalorder %s49_s29, %s1389_s17  ;;  %p1395_p7 = scmp.lt.s32.totalorder %s1389_s17, %s1389_s17 }
  0x2e   :  { %p1396_p8 = por %p1395_p7, %p1394_p6 }
  0x30   :  { %p1397_p9 = pnand %p1396_p8, %p1390_p5 }
  0x32   :  { %1400 = shalt.err (!%p1397_p9)
}
  0x33   :  { %54 = dma.hbm_to_vmem [thread:$0]  %s1663_s4, 1024, %s49_s29, [#allocation8], %s1430_s11, %s1430_s11, %s1431_s12  }
  0x34   :  { %1423 = dma.done.wait [#allocation5], 512  }
  0x35   :  { %1424 = vsyncadd [#allocation5], 4294966784 }
  0x36   :  { %1425 = dma.done.wait [#allocation8], 2048  }
  0x37   :  { %1426 = vsyncadd [#allocation8], 4294965248  ;;  %v1436_v0 = vmov 0   ;;  %v1303_v1 = vld [vmem:[%s1660_s1] sm:$0xff]   ;;  %v1304_v2 = vld [vmem:[%s1660_s1 + $0x8] sm:$0xff]  }
  0x38   :  { %1302 = vset.pattern.permute.xlu1 %v1436_v0  ;;  %1301 = vset.pattern.permute.xlu0 %v1436_v0  ;;  %v1305_v3 = vld [vmem:[%s1660_s1 + $0x10] sm:$0xff]   ;;  %v1306_v4 = vld [vmem:[%s1660_s1 + $0x18] sm:$0xff]   ;;  %v1532_v5 = vld [vmem:[#allocation4] sm:$0xff] }
  0x39   :  { %1196 = vmatprep.subr.bf16.mxu1 %v1303_v1  ;;  %v350_v6 = vunpack.c.l.s8.bf16 %v1532_v5  ;;  %v580_v7 = vld [vmem:[%s1665_s6 + $0x50] sm:$0xff]  ;;  %v578_v8 = vld [vmem:[%s1665_s6 + $0x40] sm:$0xff]  ;;  %v581_v9 = vld [vmem:[%s1665_s6 + $0x58] sm:$0xff]  ;;  %v351_v30 = vunpack.c.h.s8.bf16 %v1532_v5 }
  0x3a   :  { %1197 = vmatpush3.bf16.msra.mxu1 %v1303_v1  ;;  %638 = vperm.xlu1 %1302, %v580_v7   ;;  %v579_v10 = vld [vmem:[%s1665_s6 + $0x48] sm:$0xff]  ;;  %v1307_v11 = vld [vmem:[%s1660_s1 + $0x20] sm:$0xff]   ;;  %v1309_v17 = vld [vmem:[%s1660_s1 + $0x30] sm:$0xff]  }
  0x3b   :  { %1198 = vmatprep.subr.bf16.mxu1 %v1304_v2  ;;  %628 = vperm.xlu0 %1301, %v578_v8   ;;  %v1308_v12 = vld [vmem:[%s1660_s1 + $0x28] sm:$0xff]   ;;  %v570_v14 = vld [vmem:[%s1665_s6] sm:$0xff]  ;;  %v573_v18 = vld [vmem:[%s1665_s6 + $0x18] sm:$0xff] }
  0x3c   :  { %1212 = vmatprep.mubr.bf16.mxu1 %v350_v6  ;;  %v571_v13 = vld [vmem:[%s1665_s6 + $0x8] sm:$0xff]  ;;  %v1311_v15 = vld [vmem:[#allocation9] sm:$0xff]   ;;  %v572_v19 = vld [vmem:[%s1665_s6 + $0x10] sm:$0xff] }
  0x3d   :  { %v1312_v16 = vld [vmem:[#allocation9 + $0x8] sm:$0xff]   ;;  %1164 = vmatprep.subr.bf16.mxu0 %v1311_v15  ;;  %v1313_v20 = vld [vmem:[#allocation9 + $0x10] sm:$0xff]   ;;  %v1310_v22 = vld [vmem:[%s1660_s1 + $0x38] sm:$0xff]  }
  0x3e   :  { %1199 = vmatpush3.bf16.msra.mxu1 %v1304_v2  ;;  %643 = vperm.xlu1 %1302, %v581_v9   ;;  %v583_v21 = vld [vmem:[%s1665_s6 + $0x68] sm:$0xff]  ;;  %v582_v23 = vld [vmem:[%s1665_s6 + $0x60] sm:$0xff]  ;;  %v1314_v25 = vld [vmem:[#allocation9 + $0x18] sm:$0xff]  }
  0x3f   :  { %1200 = vmatprep.subr.bf16.mxu1 %v1305_v3  ;;  %633 = vperm.xlu0 %1301, %v579_v10   ;;  %v1319_v24 = vld [vmem:[%s1661_s2] sm:$0xff]   ;;  %v347_v26 = vld [vmem:[#allocation4 + $0x8] sm:$0xff]  ;;  %v585_v27 = vld [vmem:[%s1665_s6 + $0x78] sm:$0xff] }
  0x40   :  { %1165 = vmatpush3.bf16.msra.mxu0 %v1311_v15  ;;  %1180 = vmatprep.mubr.bf16.mxu0 %v1319_v24  ;;  %v584_v28 = vld [vmem:[%s1665_s6 + $0x70] sm:$0xff]  ;;  %v1315_v29 = vld [vmem:[#allocation9 + $0x20] sm:$0xff]   ;;  %v352_v32 = vunpack.c.l.s8.bf16 %v347_v26  ;;  %v575_v33 = vld [vmem:[%s1665_s6 + $0x28] sm:$0xff]  ;;  %v353_v41 = vunpack.c.h.s8.bf16 %v347_v26 }
  0x41   :  { %1166 = vmatprep.subr.bf16.mxu0 %v1312_v16  ;;  %v1321_v31 = vld [vmem:[#allocation7] sm:$0xff]   ;;  %v577_v35 = vld [vmem:[%s1665_s6 + $0x38] sm:$0xff]  ;;  %v1316_v36 = vld [vmem:[#allocation9 + $0x28] sm:$0xff]  }
  0x42   :  { %1201 = vmatpush3.bf16.msra.mxu1 %v1305_v3  ;;  %593 = vperm.xlu1 %1302, %v571_v13   ;;  %v574_v34 = vld [vmem:[%s1665_s6 + $0x20] sm:$0xff]  ;;  %v348_v37 = vld [vmem:[#allocation4 + $0x10] sm:$0xff]  ;;  %v1322_v39 = vld [vmem:[#allocation7 + $0x8] sm:$0xff]  }
  0x43   :  { %1202 = vmatprep.subr.bf16.mxu1 %v1306_v4  ;;  %588 = vperm.xlu0 %1301, %v570_v14   ;;  %v576_v38 = vld [vmem:[%s1665_s6 + $0x30] sm:$0xff]  ;;  %v354_v42 = vunpack.c.l.s8.bf16 %v348_v37  ;;  %v1318_v44 = vld [vmem:[#allocation9 + $0x38] sm:$0xff]   ;;  %v355_v47 = vunpack.c.h.s8.bf16 %v348_v37  ;;  %v1320_v49 = vld [vmem:[%s1661_s2 + $0x8] sm:$0xff]  }
  0x44   :  { %1167 = vmatpush3.bf16.msra.mxu0 %v1312_v16  ;;  %v1317_v40 = vld [vmem:[#allocation9 + $0x30] sm:$0xff]   ;;  %v1326_v45 = vld [vmem:[#allocation7 + $0x18] sm:$0xff]   ;;  %v1329_v50 = vld [vmem:[#allocation7 + $0x20] sm:$0xff]  }
  0x45   :  { %1168 = vmatprep.subr.bf16.mxu0 %v1313_v20  ;;  %v1325_v43 = vld [vmem:[#allocation7 + $0x10] sm:$0xff]   ;;  %v349_v46 = vld [vmem:[#allocation4 + $0x18] sm:$0xff]  ;;  %v1330_v52 = vld [vmem:[#allocation7 + $0x28] sm:$0xff]  }
  0x46   :  { %1203 = vmatpush3.bf16.msra.mxu1 %v1306_v4  ;;  %603 = vperm.xlu1 %1302, %v573_v18   ;;  %v356_v48 = vunpack.c.l.s8.bf16 %v349_v46  ;;  %v1323_v51 = vld [vmem:[%s1661_s2 + $0x10] sm:$0xff]   ;;  %v357_v53 = vunpack.c.h.s8.bf16 %v349_v46  ;;  %v1324_v54 = vld [vmem:[%s1661_s2 + $0x18] sm:$0xff]   ;;  %v1327_v55 = vld [vmem:[%s1661_s2 + $0x20] sm:$0xff]  }
  0x47   :  { %1204 = vmatprep.subr.bf16.mxu1 %v1307_v11  ;;  %598 = vperm.xlu0 %1301, %v572_v19   ;;  %v1328_v56 = vld [vmem:[%s1661_s2 + $0x28] sm:$0xff]   ;;  %v1331_v57 = vld [vmem:[%s1661_s2 + $0x30] sm:$0xff]   ;;  %v1332_v58 = vld [vmem:[%s1661_s2 + $0x38] sm:$0xff]  }
  0x48   :  { %1169 = vmatpush3.bf16.msra.mxu0 %v1313_v20  ;;  %v1333_v59 = vld [vmem:[#allocation7 + $0x30] sm:$0xff]   ;;  %v1334_v60 = vld [vmem:[#allocation7 + $0x38] sm:$0xff]  }
  0x49   :  { %1170 = vmatprep.subr.bf16.mxu0 %v1314_v25 }
  0x4a   :  { %1205 = vmatpush3.bf16.msra.mxu1 %v1307_v11  ;;  %653 = vperm.xlu1 %1302, %v583_v21  }
  0x4b   :  { %1206 = vmatprep.subr.bf16.mxu1 %v1308_v12  ;;  %648 = vperm.xlu0 %1301, %v582_v23  }
  0x4c   :  { %1171 = vmatpush3.bf16.msra.mxu0 %v1314_v25 }
  0x4d   :  { %1172 = vmatprep.subr.bf16.mxu0 %v1315_v29 }
  0x4e   :  { %1207 = vmatpush3.bf16.msra.mxu1 %v1308_v12  ;;  %663 = vperm.xlu1 %1302, %v585_v27  }
  0x4f   :  { %1208 = vmatprep.subr.bf16.mxu1 %v1309_v17  ;;  %658 = vperm.xlu0 %1301, %v584_v28  }
  0x50   :  { %1173 = vmatpush3.bf16.msra.mxu0 %v1315_v29 }
  0x51   :  { %1174 = vmatprep.subr.bf16.mxu0 %v1316_v36 }
  0x52   :  { %1209 = vmatpush3.bf16.msra.mxu1 %v1309_v17  ;;  %613 = vperm.xlu1 %1302, %v575_v33  }
  0x53   :  { %1210 = vmatprep.subr.bf16.mxu1 %v1310_v22  ;;  %608 = vperm.xlu0 %1301, %v574_v34  }
  0x54   :  { %1175 = vmatpush3.bf16.msra.mxu0 %v1316_v36 }
  0x55   :  { %1176 = vmatprep.subr.bf16.mxu0 %v1317_v40 }
  0x56   :  { %1211 = vmatpush3.bf16.msra.mxu1 %v1310_v22  ;;  %623 = vperm.xlu1 %1302, %v577_v35  }
  0x57   :  { %1260 = vmatprep.subr.bf16.mxu1 %v1321_v31  ;;  %618 = vperm.xlu0 %1301, %v576_v38  }
  0x58   :  { %1177 = vmatpush3.bf16.msra.mxu0 %v1317_v40 }
  0x59   :  { %1213 = vmatmul.mubr.bf16.vlgmr.msra.gmra.mrb[0].mxu1 %v351_v30  ;;  %1178 = vmatprep.subr.bf16.mxu0 %v1318_v44 }
  0x5a   :  { %1216 = vmatprep.mubr.bf16.mxu1 %v352_v32  ;;  %1268 = vmatpush3.bf16.msra.mxu1 %v1321_v31 }
  0x5b   :  { %1261 = vmatprep.subr.bf16.mxu1 %v1322_v39 }
  0x5c   :  { %1179 = vmatpush3.bf16.msra.mxu0 %v1318_v44 }
  0x5d   :  { %1228 = vmatprep.subr.bf16.mxu0 %v1321_v31 }
  0x5e   :  { %1269 = vmatpush3.bf16.msra.mxu1 %v1322_v39 }
  0x5f   :  { %1262 = vmatprep.subr.bf16.mxu1 %v1325_v43  ;;  %1181 = vmatmul.mubr.bf16.vlgmr.msra.gmra.mrb[0].mxu0 %v1320_v49 }
  0x60   :  { %1229 = vmatpush3.bf16.msra.mxu0 %v1321_v31  ;;  %1184 = vmatprep.mubr.bf16.mxu0 %v1323_v51 }
  0x61   :  { %1217 = vmatmul.mubr.bf16.gmra.mrb[4].mxu1 %v353_v41  ;;  %1230 = vmatprep.subr.bf16.mxu0 %v1322_v39 }
  0x62   :  { %1220 = vmatprep.mubr.bf16.mxu1 %v354_v42  ;;  %1270 = vmatpush3.bf16.msra.mxu1 %v1325_v43 }
  0x63   :  { %1263 = vmatprep.subr.bf16.mxu1 %v1326_v45 }
  0x64   :  { %1231 = vmatpush3.bf16.msra.mxu0 %v1322_v39 }
  0x65   :  { %1232 = vmatprep.subr.bf16.mxu0 %v1325_v43 }
  0x66   :  { %1271 = vmatpush3.bf16.msra.mxu1 %v1326_v45 }
  0x67   :  { %1264 = vmatprep.subr.bf16.mxu1 %v1329_v50  ;;  %1185 = vmatmul.mubr.bf16.gmra.mrb[4].mxu0 %v1324_v54 }
  0x68   :  { %1233 = vmatpush3.bf16.msra.mxu0 %v1325_v43  ;;  %1188 = vmatprep.mubr.bf16.mxu0 %v1327_v55 }
  0x69   :  { %1221 = vmatmul.mubr.bf16.gmra.mrb[8].mxu1 %v355_v47  ;;  %1234 = vmatprep.subr.bf16.mxu0 %v1326_v45 }
  0x6a   :  { %1224 = vmatprep.mubr.bf16.mxu1 %v356_v48  ;;  %1272 = vmatpush3.bf16.msra.mxu1 %v1329_v50 }
  0x6b   :  { %1265 = vmatprep.subr.bf16.mxu1 %v1330_v52 }
  0x6c   :  { %1235 = vmatpush3.bf16.msra.mxu0 %v1326_v45 }
  0x6d   :  { %1236 = vmatprep.subr.bf16.mxu0 %v1329_v50 }
  0x6e   :  { %1273 = vmatpush3.bf16.msra.mxu1 %v1330_v52 }
  0x6f   :  { %1189 = vmatmul.mubr.bf16.gmra.mrb[8].mxu0 %v1328_v56  ;;  %1266 = vmatprep.subr.bf16.mxu1 %v1333_v59 }
  0x70   :  { %1237 = vmatpush3.bf16.msra.mxu0 %v1329_v50  ;;  %1192 = vmatprep.mubr.bf16.mxu0 %v1331_v57 }
  0x71   :  { %1225 = vmatmul.mubr.bf16.gmra.mrb[12].mxu1 %v357_v53  ;;  %1238 = vmatprep.subr.bf16.mxu0 %v1330_v52 }
  0x72   :  { %1274 = vmatpush3.bf16.msra.mxu1 %v1333_v59 }
  0x73   :  { %1267 = vmatprep.subr.bf16.mxu1 %v1334_v60 }
  0x74   :  { %1239 = vmatpush3.bf16.msra.mxu0 %v1330_v52 }
  0x75   :  { %1240 = vmatprep.subr.bf16.mxu0 %v1333_v59 }
  0x76   :  { %1275 = vmatpush3.bf16.msra.mxu1 %v1334_v60 }
  0x77   :  { %1193 = vmatmul.mubr.bf16.gmra.mrb[12].mxu0 %v1332_v58 }
  0x78   :  { %1241 = vmatpush3.bf16.msra.mxu0 %v1333_v59 }
  0x79   :  { %1242 = vmatprep.subr.bf16.mxu0 %v1334_v60 }
  0x7c   :  { %1243 = vmatpush3.bf16.msra.mxu0 %v1334_v60 }
  0xb9   :  { %v639_v61 = vpop.permute.xlu1 %638 }
  0xba   :  { %v629_v62 = vpop.permute.xlu0 %628 }
  0xbd   :  { %v644_v63 = vpop.permute.xlu1 %643 }
  0xbe   :  { %v634_v0 = vpop.permute.xlu0 %633 }
  0xc1   :  { %v594_v1 = vpop.permute.xlu1 %593 }
  0xc2   :  { %v589_v2 = vpop.permute.xlu0 %588 }
  0xc5   :  { %v604_v3 = vpop.permute.xlu1 %603 }
  0xc6   :  { %v599_v4 = vpop.permute.xlu0 %598 }
  0xc9   :  { %v654_v5 = vpop.permute.xlu1 %653 }
  0xca   :  { %v649_v6 = vpop.permute.xlu0 %648 }
  0xcd   :  { %v664_v7 = vpop.permute.xlu1 %663 }
  0xce   :  { %v659_v8 = vpop.permute.xlu0 %658 }
  0xd1   :  { %v614_v12 = vpop.permute.xlu1 %613 }
  0xd2   :  { %v609_v16 = vpop.permute.xlu0 %608 }
  0xd5   :  { %v624_v22 = vpop.permute.xlu1 %623 }
  0xd6   :  { %v619_v24 = vpop.permute.xlu0 %618 }
 0x12c   :  { %v1214_v9 = vpop.f32.mrb[0].mxu1 }
 0x12d   :  { %v456_v10 = vpop.f32.mrb[1].mxu1  ;;  %v668_v13 = vmul.f32 %v1214_v9, %v599_v4 }
 0x12e   :  { %v1215_v11 = vpop.f32.mrb[2].mxu1  ;;  %v666_v17 = vmul.f32 %v589_v2, %v456_v10 }
 0x12f   :  { %v669_v14 = vmul.f32 %v1215_v11, %v604_v3  ;;  %v459_v15 = vpop.f32.mrb[3].mxu1 }
 0x130   :  { %v667_v18 = vmul.f32 %v594_v1, %v459_v15 }
 0x131   :  { %v683_v19 = vpack.c.bf16 %v669_v14, %v668_v13 }
 0x132   :  { %v682_v20 = vpack.c.bf16 %v667_v18, %v666_v17 }
 0x134   :  { %v1218_v21 = vpop.f32.mrb[4].mxu1  ;;  %1244 = vmatprep.mubr.bf16.mxu0 %v682_v20 }
 0x135   :  { %v472_v23 = vpop.f32.mrb[5].mxu1  ;;  %1245 = vmatmul.mubr.bf16.vlgmr.msra.gmra.mrb[0].mxu0 %v683_v19  ;;  %v672_v26 = vmul.f32 %v1218_v21, %v619_v24 }
 0x136   :  { %v1219_v25 = vpop.f32.mrb[6].mxu1  ;;  %v670_v29 = vmul.f32 %v609_v16, %v472_v23 }
 0x137   :  { %v673_v27 = vmul.f32 %v1219_v25, %v624_v22  ;;  %v475_v28 = vpop.f32.mrb[7].mxu1 }
 0x138   :  { %v671_v30 = vmul.f32 %v614_v12, %v475_v28 }
 0x139   :  { %v685_v31 = vpack.c.bf16 %v673_v27, %v672_v26 }
 0x13a   :  { %v684_v32 = vpack.c.bf16 %v671_v30, %v670_v29 }
 0x13c   :  { %v1222_v33 = vpop.f32.mrb[8].mxu1  ;;  %1248 = vmatprep.mubr.bf16.mxu0 %v684_v32 }
 0x13d   :  { %v488_v34 = vpop.f32.mrb[9].mxu1  ;;  %1249 = vmatmul.mubr.bf16.gmra.mrb[4].mxu0 %v685_v31  ;;  %v676_v36 = vmul.f32 %v1222_v33, %v639_v61  ;;  %v1625_v61 = vld [vmem:[%s1664_s5] ss:$0 sm:$0xff]  ;;  %s1437_s5 = smov [#allocation10]  }
 0x13e   :  { %v1223_v35 = vpop.f32.mrb[10].mxu1  ;;  %v674_v39 = vmul.f32 %v629_v62, %v488_v34  ;;  %s991_s30 = sshll.u32 %s1437_s5, 4  ;;  %s992_s30 = int_to_ptr.vmem [resolvable:$true] %s991_s30 }
 0x13f   :  { %v677_v37 = vmul.f32 %v1223_v35, %v644_v63  ;;  %v491_v38 = vpop.f32.mrb[11].mxu1  ;;  %s1401_s8 = scalar_lea.vmem %s992_s30, 1024  ;;  %p1406_p11 = scmp.lt.s32.totalorder %s992_s30, %s992_s30 }
 0x140   :  { %v675_v40 = vmul.f32 %v634_v0, %v491_v38  ;;  %p1402_p10 = scmp.ne.s32.totalorder %s992_s30, %s1401_s8  ;;  %p1407_p12 = scmp.lt.s32.totalorder %s1401_s8, %s1401_s8 }
 0x141   :  { %v687_v41 = vpack.c.bf16 %v677_v37, %v676_v36 }
 0x142   :  { %v686_v42 = vpack.c.bf16 %v675_v40, %v674_v39  ;;  %v1190_v53 = vpop.f32.mrb[8].mxu0  ;;  %p1408_p13 = por %p1407_p12, %p1406_p11 }
 0x143   :  { %v283_v54 = vpop.f32.mrb[9].mxu0 }
 0x144   :  { %v1226_v43 = vpop.f32.mrb[12].mxu1  ;;  %1252 = vmatprep.mubr.bf16.mxu1 %v686_v42  ;;  %v1191_v55 = vpop.f32.mrb[10].mxu0  ;;  %p1409_p0 = pnand %p1408_p13, %p1402_p10 }
 0x145   :  { %v504_v44 = vpop.f32.mrb[13].mxu1  ;;  %1253 = vmatmul.mubr.bf16.vlgmr.msra.gmra.mrb[16].mxu1 %v687_v41  ;;  %v680_v46 = vmul.f32 %v1226_v43, %v659_v8  ;;  %v286_v56 = vpop.f32.mrb[11].mxu0 }
 0x146   :  { %v1227_v45 = vpop.f32.mrb[14].mxu1  ;;  %v678_v49 = vmul.f32 %v649_v6, %v504_v44 }
 0x147   :  { %v681_v47 = vmul.f32 %v1227_v45, %v664_v7  ;;  %v507_v48 = vpop.f32.mrb[15].mxu1 }
 0x148   :  { %v679_v50 = vmul.f32 %v654_v5, %v507_v48 }
 0x149   :  { %v689_v51 = vpack.c.bf16 %v681_v47, %v680_v46 }
 0x14a   :  { %v688_v52 = vpack.c.bf16 %v679_v50, %v678_v49  ;;  %v1194_v57 = vpop.f32.mrb[12].mxu0 }
 0x14b   :  { %v299_v58 = vpop.f32.mrb[13].mxu0 }
 0x14c   :  { %1256 = vmatprep.mubr.bf16.mxu1 %v688_v52  ;;  %v1195_v59 = vpop.f32.mrb[14].mxu0 }
 0x14d   :  { %1257 = vmatmul.mubr.bf16.gmra.mrb[20].mxu1 %v689_v51  ;;  %v1620_v60 = vpop.f32.mrb[15].mxu0 }
 0x208   :  { %v1246_v62 = vpop.f32.mrb[0].mxu0 }
 0x209   :  { %v876_v63 = vadd.f32 %v1246_v62, %v1625_v61  ;;  %v804_v0 = vpop.f32.mrb[1].mxu0 }
 0x20a   :  { %v874_v1 = vadd.f32 %v1625_v61, %v804_v0  ;;  %v1247_v2 = vpop.f32.mrb[2].mxu0 }
 0x20b   :  { %v877_v3 = vadd.f32 %v1247_v2, %v1625_v61  ;;  %v807_v4 = vpop.f32.mrb[3].mxu0  ;;  %v892_v6 = vmax.f32 %v876_v63, 0.0 }
 0x20c   :  { %v875_v5 = vadd.f32 %v1625_v61, %v807_v4  ;;  %v890_v8 = vmax.f32 %v874_v1, 0.0 }
 0x20d   :  { %v893_v7 = vmax.f32 %v877_v3, 0.0 }
 0x20e   :  { %v891_v9 = vmax.f32 %v875_v5, 0.0 }
 0x20f   :  { %v1077_v10 = vpack.c.bf16 %v893_v7, %v892_v6 }
 0x210   :  { %v1072_v11 = vpack.c.bf16 %v891_v9, %v890_v8  ;;  %v1250_v12 = vpop.f32.mrb[4].mxu0 }
 0x211   :  { %1109 = vst [vmem:[#allocation10 + $0x8] sm:$0xff] %v1077_v10   ;;  %v880_v13 = vadd.f32 %v1250_v12, %v1625_v61  ;;  %v820_v14 = vpop.f32.mrb[5].mxu0 }
 0x212   :  { %1073 = vst [vmem:[#allocation10] sm:$0xff] %v1072_v11   ;;  %v878_v15 = vadd.f32 %v1625_v61, %v820_v14  ;;  %v1251_v16 = vpop.f32.mrb[6].mxu0 }
 0x213   :  { %v881_v17 = vadd.f32 %v1251_v16, %v1625_v61  ;;  %v823_v18 = vpop.f32.mrb[7].mxu0  ;;  %v896_v20 = vmax.f32 %v880_v13, 0.0 }
 0x214   :  { %v879_v19 = vadd.f32 %v1625_v61, %v823_v18  ;;  %v894_v22 = vmax.f32 %v878_v15, 0.0 }
 0x215   :  { %v897_v21 = vmax.f32 %v881_v17, 0.0 }
 0x216   :  { %v895_v23 = vmax.f32 %v879_v19, 0.0 }
 0x217   :  { %v1087_v24 = vpack.c.bf16 %v897_v21, %v896_v20 }
 0x218   :  { %v1082_v25 = vpack.c.bf16 %v895_v23, %v894_v22  ;;  %v1254_v26 = vpop.f32.mrb[16].mxu1 }
 0x219   :  { %1111 = vst [vmem:[#allocation10 + $0x18] sm:$0xff] %v1087_v24   ;;  %v845_v27 = vadd.f32 %v1254_v26, %v1190_v53  ;;  %v836_v28 = vpop.f32.mrb[17].mxu1 }
 0x21a   :  { %1110 = vst [vmem:[#allocation10 + $0x10] sm:$0xff] %v1082_v25   ;;  %v837_v29 = vadd.f32 %v836_v28, %v283_v54  ;;  %v1255_v30 = vpop.f32.mrb[18].mxu1 }
 0x21b   :  { %v884_v31 = vadd.f32 %v1625_v61, %v845_v27  ;;  %v848_v32 = vadd.f32 %v1255_v30, %v1191_v55  ;;  %v839_v33 = vpop.f32.mrb[19].mxu1 }
 0x21c   :  { %v882_v34 = vadd.f32 %v1625_v61, %v837_v29  ;;  %v840_v35 = vadd.f32 %v839_v33, %v286_v56 }
 0x21d   :  { %v885_v36 = vadd.f32 %v1625_v61, %v848_v32  ;;  %v900_v38 = vmax.f32 %v884_v31, 0.0 }
 0x21e   :  { %v883_v37 = vadd.f32 %v1625_v61, %v840_v35  ;;  %v898_v40 = vmax.f32 %v882_v34, 0.0 }
 0x21f   :  { %v901_v39 = vmax.f32 %v885_v36, 0.0 }
 0x220   :  { %v899_v41 = vmax.f32 %v883_v37, 0.0  ;;  %v1258_v42 = vpop.f32.mrb[20].mxu1 }
 0x221   :  { %v1097_v43 = vpack.c.bf16 %v901_v39, %v900_v38  ;;  %v861_v44 = vadd.f32 %v1258_v42, %v1194_v57  ;;  %v852_v45 = vpop.f32.mrb[21].mxu1 }
 0x222   :  { %v1092_v46 = vpack.c.bf16 %v899_v41, %v898_v40  ;;  %v853_v47 = vadd.f32 %v852_v45, %v299_v58  ;;  %v1259_v48 = vpop.f32.mrb[22].mxu1 }
 0x223   :  { %1113 = vst [vmem:[#allocation10 + $0x28] sm:$0xff] %v1097_v43   ;;  %v888_v49 = vadd.f32 %v1625_v61, %v861_v44  ;;  %v864_v50 = vadd.f32 %v1259_v48, %v1195_v59  ;;  %v855_v51 = vpop.f32.mrb[23].mxu1 }
 0x224   :  { %1112 = vst [vmem:[#allocation10 + $0x20] sm:$0xff] %v1092_v46   ;;  %v886_v52 = vadd.f32 %v1625_v61, %v853_v47  ;;  %v856_v53 = vadd.f32 %v855_v51, %v1620_v60 }
 0x225   :  { %v889_v54 = vadd.f32 %v1625_v61, %v864_v50  ;;  %v904_v56 = vmax.f32 %v888_v49, 0.0 }
 0x226   :  { %v887_v55 = vadd.f32 %v1625_v61, %v856_v53  ;;  %v902_v58 = vmax.f32 %v886_v52, 0.0 }
 0x227   :  { %v905_v57 = vmax.f32 %v889_v54, 0.0 }
 0x228   :  { %v903_v62 = vmax.f32 %v887_v55, 0.0 }
 0x229   :  { %v1107_v63 = vpack.c.bf16 %v905_v57, %v904_v56 }
 0x22a   :  { %v1102_v0 = vpack.c.bf16 %v903_v62, %v902_v58 }
 0x22b   :  { %1115 = vst [vmem:[#allocation10 + $0x38] sm:$0xff] %v1107_v63  }
 0x22c   :  { %1114 = vst [vmem:[#allocation10 + $0x30] sm:$0xff] %v1102_v0  }
 0x22d   :  { %1412 = shalt.err (!%p1409_p0)
}
 0x22e   :  { %s1413_s13 = scalar_lea.hbm %s1666_s7, 1024 }
 0x22f   :  { %p1414_p1 = scmp.ne.s32.totalorder %s1666_s7, %s1413_s13  ;;  %p1417_p2 = scmp.lt.u32.totalorder %s1413_s13, %s1666_s7 }
 0x231   :  { %p1419_p3 = pnand %p1417_p2, %p1414_p1 }
 0x233   :  { %1422 = shalt.err (!%p1419_p3)
}
 0x234   :  { %997 = dma.vmem_to_hbm [thread:$0]  %s992_s30, 1024, %s1666_s7, [#allocation6], %s1430_s11, %s1430_s11, %s1431_s12  }
 0x235   :  { %1427 = dma.done.wait [#allocation6], 1024  }
 0x236   :  { %1428 = vsyncadd [#allocation6], 4294966272 }
 0x237   :  { %1001 = vsyncpa [#allocation5], 1 }
 0x238   :  { %1002 = vsyncpa [#allocation8], 1 }
 0x239   :  { %1003 = vsyncpa [#allocation6], 1 }

</bundles_post_ra>
